<compile_context>
chip_gen: v7x
topology: tpu7x:2x2x1
jax: 0.10.0
libtpu: 0.0.40
codegen_flags: <defaults>
</compile_context>

<pallas_src>
import functools

import jax
import jax.numpy as jnp
from jax import lax
from jax.experimental import pallas as pl
from jax.experimental.pallas import tpu as pltpu

LANE = 128
SUBLANE = 8
NO_GRID_MAX_B = 2048     # single-invocation path up to this batch size
DEFAULT_BLOCK_B = 1024   # gridded tile (multiple of 8); B > 2048 => >= 2 blocks


def _round_up(n, m):
    return ((n + m - 1) // m) * m


def _f32_bytes(*arrays):
    return int(sum(a.size * a.dtype.itemsize for a in arrays))


# --------------------------------------------------------------------------
# Kernels
# --------------------------------------------------------------------------
def dqn_kernel(x_ref, w1_ref, b1_ref, w2_ref, b2_ref, o_ref):
    # Hidden layer: (B, K) @ (K, Hp) + (1, Hp), ReLU  (MXU + VPU, f32 acc).
    h = jnp.dot(x_ref[...], w1_ref[...], preferred_element_type=jnp.float32)
    h = jnp.maximum(h + b1_ref[...], 0.0)
    # Output layer: (B, Hp) @ (Hp, Np) + (1, Np); Np is lane-padded
    # (128-multiple), so this store is a full, unmasked vst.
    y = jnp.dot(h, w2_ref[...], preferred_element_type=jnp.float32)
    o_ref[...] = (y + b2_ref[...]).astype(o_ref.dtype)


def dqn_argmax_kernel(x_ref, w1_ref, b1_ref, w2_ref, b2_ref, a_ref, *,
                      out_actions):
    # Fused fc1 -> ReLU -> out -> greedy action (first-max semantics, like
    # torch.argmax on ties).  Padded action lanes are masked out, so only the
    # real columns can win; output is a tiny (B, 1) int32 instead of the
    # 128-lane padded Q slab.
    h = jnp.dot(x_ref[...], w1_ref[...], preferred_element_type=jnp.float32)
    h = jnp.maximum(h + b1_ref[...], 0.0)
    q = jnp.dot(h, w2_ref[...], preferred_element_type=jnp.float32)
    q = q + b2_ref[...]
    np_padded = q.shape[-1]
    col = lax.broadcasted_iota(jnp.int32, q.shape, 1)
    valid = col < out_actions
    qm = jnp.where(valid, q, -jnp.inf)
    qmax = jnp.max(qm, axis=-1, keepdims=True)
    cand = jnp.where((qm == qmax) & valid, col, np_padded)
    a_ref[...] = jnp.min(cand, axis=-1, keepdims=True).astype(jnp.int32)


# --------------------------------------------------------------------------
# Wrappers
# --------------------------------------------------------------------------
def dqn_qvalues_padded(x, params, *, block_b=DEFAULT_BLOCK_B,
                       no_grid_max=NO_GRID_MAX_B):
    """Lane-padded Q values. Rows may be padded up to a multiple of 8 on the
    small-batch path; columns are the 128-padded action lanes."""
    w1, b1, w2, b2 = params
    B, K = x.shape
    Hp = w1.shape[1]
    Np = w2.shape[1]
    flops = 2 * B * (K * Hp + Hp * Np)
    w_bytes = _f32_bytes(w1, b1, w2, b2)

    if B <= no_grid_max:
        # Overhead-bound regime: one invocation, no grid, all operands VMEM.
        Bp = _round_up(max(B, SUBLANE), SUBLANE)
        if Bp != B:
            x = jnp.pad(x, ((0, Bp - B), (0, 0)))  # tiny; fused under jit
        cost = pl.CostEstimate(
            flops=flops, transcendentals=0,
            bytes_accessed=Bp * K * 4 + w_bytes + Bp * Np * 4)
        return pl.pallas_call(
            dqn_kernel,
            out_shape=jax.ShapeDtypeStruct((Bp, Np), jnp.float32),
            in_specs=[pl.BlockSpec(memory_space=pltpu.MemorySpace.VMEM)] * 5,
            out_specs=pl.BlockSpec(memory_space=pltpu.MemorySpace.VMEM),
            cost_estimate=cost,
        )(x, w1, b1, w2, b2)

    # Replay-buffer regime: tile the batch, weights stay VMEM-resident across
    # grid steps (constant index_map); batch axis "parallel" so v7x's two
    # TensorCores both get work (nb >= 2 since B > no_grid_max >= block_b).
    # No jnp.pad of x: a ragged last block is masked on writeback by Pallas.
    nb = pl.cdiv(B, block_b)
    cost = pl.CostEstimate(
        flops=flops, transcendentals=0,
        bytes_accessed=B * K * 4 + w_bytes + B * Np * 4)
    return pl.pallas_call(
        dqn_kernel,
        out_shape=jax.ShapeDtypeStruct((B, Np), jnp.float32),
        grid=(nb,),
        in_specs=[
            pl.BlockSpec((block_b, K), lambda i: (i, 0)),
            pl.BlockSpec((K, Hp), lambda i: (0, 0)),
            pl.BlockSpec((1, Hp), lambda i: (0, 0)),
            pl.BlockSpec((Hp, Np), lambda i: (0, 0)),
            pl.BlockSpec((1, Np), lambda i: (0, 0)),
        ],
        out_specs=pl.BlockSpec((block_b, Np), lambda i: (i, 0)),
        compiler_params=pltpu.CompilerParams(
            dimension_semantics=("parallel",)),
        cost_estimate=cost,
    )(x, w1, b1, w2, b2)


@functools.partial(jax.jit,
                   static_argnames=("out_actions", "block_b", "no_grid_max"))
def dqn_forward(x, params, out_actions, block_b=DEFAULT_BLOCK_B,
                no_grid_max=NO_GRID_MAX_B):
    """Q(x) with the original nn.Module semantics: (B, out_actions) f32.
    jit-compiled so the row/column un-padding slices live in the same
    dispatch as the kernel (or fuse into the caller when inlined)."""
    q = dqn_qvalues_padded(x, params, block_b=block_b, no_grid_max=no_grid_max)
    return q[: x.shape[0], :out_actions]


@functools.partial(jax.jit, static_argnames=("out_actions",))
def dqn_select_action(x, params, out_actions):
    """Greedy-action inference path (small B): argmax computed in-kernel,
    (B,) int32 output — no padded Q writeback, no separate XLA argmax."""
    w1, b1, w2, b2 = params
    B, K = x.shape
    Hp = w1.shape[1]
    flops = 2 * B * (K * Hp + Hp * w2.shape[1])
    cost = pl.CostEstimate(
        flops=flops, transcendentals=0,
        bytes_accessed=B * K * 4 + _f32_bytes(w1, b1, w2, b2) + B * 4)
    a = pl.pallas_call(
        functools.partial(dqn_argmax_kernel, out_actions=out_actions),
        out_shape=jax.ShapeDtypeStruct((B, 1), jnp.int32),
        in_specs=[pl.BlockSpec(memory_space=pltpu.MemorySpace.VMEM)] * 5,
        out_specs=pl.BlockSpec(memory_space=pltpu.MemorySpace.VMEM),
        cost_estimate=cost,
    )(x, w1, b1, w2, b2)
    return a[:, 0]


# --------------------------------------------------------------------------
# Parameters
# --------------------------------------------------------------------------
def init_dqn_params(key, in_states, h1_nodes, out_actions, dtype=jnp.float32):
    """Mirror nn.Linear's U(-1/sqrt(fan_in), 1/sqrt(fan_in)); weights stored
    transposed vs PyTorch, i.e. (in, out)."""
    k1, k2, k3, k4 = jax.random.split(key, 4)
    lim1 = float(in_states) ** -0.5
    lim2 = float(h1_nodes) ** -0.5
    w1 = jax.random.uniform(k1, (in_states, h1_nodes), dtype, -lim1, lim1)
    b1 = jax.random.uniform(k2, (1, h1_nodes), dtype, -lim1, lim1)
    w2 = jax.random.uniform(k3, (h1_nodes, out_actions), dtype, -lim2, lim2)
    b2 = jax.random.uniform(k4, (1, out_actions), dtype, -lim2, lim2)
    return w1, b1, w2, b2


def pad_params(w1, b1, w2, b2):
    """One-time (init-time) zero padding of hidden/output dims to
    128-multiples for clean (8,128) tiles and lane-dense stores. Numerically
    a no-op: padded hidden units are relu(0+0)=0, padded output columns are 0
    and never selected (masked in the argmax kernel, sliced away in forward)."""
    _, H = w1.shape
    N = w2.shape[1]
    Hp = _round_up(H, LANE)
    Np = _round_up(N, LANE)
    w1p = jnp.pad(w1, ((0, 0), (0, Hp - H)))
    b1p = jnp.pad(b1, ((0, 0), (0, Hp - H)))
    w2p = jnp.pad(w2, ((0, Hp - H), (0, Np - N)))
    b2p = jnp.pad(b2, ((0, 0), (0, Np - N)))
    return w1p, b1p, w2p, b2p


if __name__ == "__main__":
    in_states, h1_nodes, out_actions = 16, 32, 4
    batch = 2

    key = jax.random.PRNGKey(0)
    kx, kp, kb = jax.random.split(key, 3)
    x = jax.random.normal(kx, (batch, in_states), jnp.float32)
    w1, b1, w2, b2 = init_dqn_params(kp, in_states, h1_nodes, out_actions)
    params = pad_params(w1, b1, w2, b2)

    def ref_fn(xs):
        return jnp.maximum(xs @ w1 + b1, 0.0) @ w2 + b2

    # 1) Small-batch (single-invocation, no-grid) Q-value path.
    out = dqn_forward(x, params, out_actions)
    jax.block_until_ready(out)
    assert out.shape == (batch, out_actions)
    assert jnp.allclose(out, ref_fn(x), atol=1e-5, rtol=1e-5)

    # 2) Fused in-kernel argmax (greedy-action inference path).
    act = dqn_select_action(x, params, out_actions)
    jax.block_until_ready(act)
    assert act.shape == (batch,)
    assert jnp.array_equal(act, jnp.argmax(ref_fn(x), axis=-1))

    # 3) Replay-buffer-sized batch exercising the gridded, weight-resident
    #    path (B > 2048 -> 4 grid blocks of 1024 rows).
    xb = jax.random.normal(kb, (4096, in_states), jnp.float32)
    outb = dqn_forward(xb, params, out_actions)
    jax.block_until_ready(outb)
    assert outb.shape == (4096, out_actions)
    assert jnp.allclose(outb, ref_fn(xb), atol=1e-4, rtol=1e-4)

    print("KERNEL_OK")
</pallas_src>

<mosaic_0001>
module attributes {stable_mosaic.version = 11 : i64} {
  func.func @dqn_kernel(%arg0: memref<8x16xf32, #tpu.memory_space<vmem>>, %arg1: memref<16x128xf32, #tpu.memory_space<vmem>>, %arg2: memref<1x128xf32, #tpu.memory_space<vmem>>, %arg3: memref<128x128xf32, #tpu.memory_space<vmem>>, %arg4: memref<1x128xf32, #tpu.memory_space<vmem>>, %arg5: memref<8x128xf32, #tpu.memory_space<vmem>>) attributes {dimension_semantics = [], scalar_prefetch = 0 : i64, scratch_operands = 0 : i64, tpu.core_type = #tpu.core_type<tc>} {
    %c0 = arith.constant 0 : index
    %c0_0 = arith.constant 0 : index
    %0 = vector.load %arg0[%c0, %c0_0] : memref<8x16xf32, #tpu.memory_space<vmem>>, vector<8x16xf32>
    %c0_1 = arith.constant 0 : index
    %c0_2 = arith.constant 0 : index
    %1 = vector.load %arg1[%c0_1, %c0_2] : memref<16x128xf32, #tpu.memory_space<vmem>>, vector<16x128xf32>
    %cst = arith.constant dense<0.000000e+00> : vector<8x128xf32>
    %2 = tpu.matmul %0, %1, %cst {dimension_numbers = #tpu.dot_dimension_numbers<[1], [0], [0], [1], [0, 0, 1, 1], [], []>} : vector<8x16xf32>, vector<16x128xf32>, vector<8x128xf32> -> vector<8x128xf32>
    %c0_3 = arith.constant 0 : index
    %c0_4 = arith.constant 0 : index
    %3 = vector.load %arg2[%c0_3, %c0_4] : memref<1x128xf32, #tpu.memory_space<vmem>>, vector<1x128xf32>
    %4 = vector.broadcast %3 : vector<1x128xf32> to vector<8x128xf32>
    %5 = arith.addf %2, %4 : vector<8x128xf32>
    %cst_5 = arith.constant 0.000000e+00 : f32
    %6 = vector.broadcast %cst_5 : f32 to vector<8x128xf32>
    %7 = arith.maximumf %5, %6 : vector<8x128xf32>
    %c0_6 = arith.constant 0 : index
    %c0_7 = arith.constant 0 : index
    %8 = vector.load %arg3[%c0_6, %c0_7] : memref<128x128xf32, #tpu.memory_space<vmem>>, vector<128x128xf32>
    %cst_8 = arith.constant dense<0.000000e+00> : vector<8x128xf32>
    %9 = tpu.matmul %7, %8, %cst_8 {dimension_numbers = #tpu.dot_dimension_numbers<[1], [0], [0], [1], [0, 0, 1, 1], [], []>} : vector<8x128xf32>, vector<128x128xf32>, vector<8x128xf32> -> vector<8x128xf32>
    %c0_9 = arith.constant 0 : index
    %c0_10 = arith.constant 0 : index
    %10 = vector.load %arg4[%c0_9, %c0_10] : memref<1x128xf32, #tpu.memory_space<vmem>>, vector<1x128xf32>
    %11 = vector.broadcast %10 : vector<1x128xf32> to vector<8x128xf32>
    %12 = arith.addf %9, %11 : vector<8x128xf32>
    %c0_11 = arith.constant 0 : index
    %c0_12 = arith.constant 0 : index
    %13 = vector.load %arg5[%c0_11, %c0_12] : memref<8x128xf32, #tpu.memory_space<vmem>>, vector<8x128xf32>
    tpu.vector_store %arg5[%c0_11, %c0_12], %12 {strides = array<i32>} : memref<8x128xf32, #tpu.memory_space<vmem>>, vector<8x128xf32>,
    return
  }
}

</mosaic_0001>

<bundles_post_ra>
// kernel: dqn_forward.1
= control target key start
LH: loop header
LB: loop body
LE: loop exit
PB: predicated region body
PF: predicated region fallthrough
CT: control target
= control target key end

     0   :  { %10 = vsyncpa [#allocation3], 0  ;;  %s453_s0 = inlined_call_operand.vmem [shape: f32[8,16], index: 0, kind: input, shape index: {}]   ;;  %s454_s1 = inlined_call_operand.hbm [shape: f32[16,128], index: 1, kind: input, shape index: {}]   ;;  %s455_s2 = inlined_call_operand.vmem [shape: f32[1,128], index: 2, kind: input, shape index: {}]   ;;  %s456_s3 = inlined_call_operand.hbm [shape: f32[128,128], index: 3, kind: input, shape index: {}]   ;;  %s457_s4 = inlined_call_operand.vmem [shape: f32[1,128], index: 4, kind: input, shape index: {}]   ;;  %s458_s5 = inlined_call_operand.vmem [shape: f32[8,128], index: 5, kind: output, shape index: {}]  }
   0x1   :  { %11 = vsyncpa [#allocation5], 0  ;;  %s380_s18 = smov [#allocation2]   ;;  %s332_s22 = scalar_lea.hbm %s454_s1, 256 }
   0x2   :  { %s19_s19 = sshll.u32 %s380_s18, 4  ;;  %p333_p0 = scmp.ne.s32.totalorder %s454_s1, %s332_s22  ;;  %s20_s19 = int_to_ptr.vmem [resolvable:$true] %s19_s19 }
   0x3   :  { %p336_p1 = scmp.lt.u32.totalorder %s332_s22, %s454_s1 }
   0x5   :  { %p338_p2 = pnand %p336_p1, %p333_p0 }
   0x7   :  { %341 = shalt.err (!%p338_p2)
}
   0x8   :  { %s342_s27 = scalar_lea.vmem %s20_s19, 256  ;;  %p347_p4 = scmp.lt.s32.totalorder %s20_s19, %s20_s19 }
   0x9   :  { %p343_p3 = scmp.ne.s32.totalorder %s20_s19, %s342_s27  ;;  %p348_p5 = scmp.lt.s32.totalorder %s342_s27, %s342_s27 }
   0xb   :  { %p349_p6 = por %p348_p5, %p347_p4 }
   0xd   :  { %p350_p7 = pnand %p349_p6, %p343_p3 }
   0xf   :  { %353 = shalt.err (!%p350_p7)
}
  0x10   :  { %s381_s28 = smov 128   ;;  %s382_s29 = smov 8  }
  0x11   :  { %25 = dma.hbm_to_vmem [thread:$0]  %s454_s1, 256, %s20_s19, [#allocation3], %s381_s28, %s381_s28, %s382_s29  }
  0x12   :  { %s383_s7 = smov [#allocation4]   ;;  %s354_s11 = scalar_lea.hbm %s456_s3, 2048 }
  0x13   :  { %s33_s8 = sshll.u32 %s383_s7, 4  ;;  %p355_p8 = scmp.ne.s32.totalorder %s456_s3, %s354_s11  ;;  %s34_s8 = int_to_ptr.vmem [resolvable:$true] %s33_s8 }
  0x14   :  { %p358_p9 = scmp.lt.u32.totalorder %s354_s11, %s456_s3 }
  0x16   :  { %p360_p10 = pnand %p358_p9, %p355_p8 }
  0x18   :  { %363 = shalt.err (!%p360_p10)
}
  0x19   :  { %s364_s16 = scalar_lea.vmem %s34_s8, 2048  ;;  %p369_p12 = scmp.lt.s32.totalorder %s34_s8, %s34_s8 }
  0x1a   :  { %p365_p11 = scmp.ne.s32.totalorder %s34_s8, %s364_s16  ;;  %p370_p13 = scmp.lt.s32.totalorder %s364_s16, %s364_s16 }
  0x1c   :  { %p371_p0 = por %p370_p13, %p369_p12 }
  0x1e   :  { %p372_p1 = pnand %p371_p0, %p365_p11 }
  0x20   :  { %375 = shalt.err (!%p372_p1)
}
  0x21   :  { %39 = dma.hbm_to_vmem [thread:$0]  %s456_s3, 2048, %s34_s8, [#allocation5], %s381_s28, %s381_s28, %s382_s29  }
  0x22   :  { %376 = dma.done.wait [#allocation3], 256  }
  0x23   :  { %377 = vsyncadd [#allocation3], 4294967040 }
  0x24   :  { %378 = dma.done.wait [#allocation5], 2048  }
  0x25   :  { %379 = vsyncadd [#allocation5], 4294965248  ;;  %v384_v0 = vmov 0.0|0.0   ;;  %vm385_vm0 = vmmov 0   ;;  %v386_v1 = vmov 0.0   ;;  %v49_v2 = vld [vmem:[#allocation2] sm:$0xff] }
  0x26   :  { %298 = vmatprep.subr.bf16.mxu0 %v384_v0  ;;  %260 = vmatprep.mubr.msk.f32.mxu0 %vm385_vm0, %v386_v1  ;;  %v50_v3 = vld [vmem:[#allocation2 + $0x8] sm:$0xff]  ;;  %v133_v5 = vld [vmem:[#allocation4] sm:$0xff]  ;;  %v134_v6 = vld [vmem:[#allocation4 + $0x8] sm:$0xff]  ;;  %vm58_vm1 = vcmask 130048  }
  0x27   :  { %301 = vmatprep.subr.bf16.mxu1 %v384_v0  ;;  %295 = vmatprep.mubr.msk.f32.mxu1 %vm385_vm0, %v386_v1  ;;  %v299_v4 = vpack.c.bf16 %v50_v3, %v49_v2  ;;  %v135_v7 = vld [vmem:[#allocation4 + $0x10] sm:$0xff]  ;;  %v302_v8 = vpack.c.bf16 %v134_v6, %v133_v5  ;;  %v136_v9 = vld [vmem:[#allocation4 + $0x18] sm:$0xff]  ;;  %v137_v12 = vld [vmem:[#allocation4 + $0x20] sm:$0xff] }
  0x28   :  { %v48_v10 = vld [vmem:[%s453_s0] sm:$0xff]  ;;  %v305_v11 = vpack.c.bf16 %v136_v9, %v135_v7  ;;  %v138_v13 = vld [vmem:[#allocation4 + $0x28] sm:$0xff]  ;;  %v140_v16 = vld [vmem:[#allocation4 + $0x38] sm:$0xff] }
  0x29   :  { %300 = vmatpush3.bf16.msra.mxu0 %v299_v4  ;;  %303 = vmatpush3.bf16.msra.mxu1 %v302_v8  ;;  %v308_v14 = vpack.c.bf16 %v138_v13, %v137_v12  ;;  %v139_v15 = vld [vmem:[#allocation4 + $0x30] sm:$0xff]  ;;  %v141_v18 = vld [vmem:[#allocation4 + $0x40] sm:$0xff]  ;;  %v142_v19 = vld [vmem:[#allocation4 + $0x48] sm:$0xff] }
  0x2a   :  { %304 = vmatprep.subr.bf16.mxu1 %v384_v0  ;;  %v311_v17 = vpack.c.bf16 %v140_v16, %v139_v15  ;;  %v314_v20 = vpack.c.bf16 %v142_v19, %v141_v18  ;;  %v143_v21 = vld [vmem:[#allocation4 + $0x50] sm:$0xff]  ;;  %v144_v22 = vld [vmem:[#allocation4 + $0x58] sm:$0xff]  ;;  %v145_v24 = vld [vmem:[#allocation4 + $0x60] sm:$0xff] }
  0x2b   :  { %v317_v23 = vpack.c.bf16 %v144_v22, %v143_v21  ;;  %v146_v25 = vld [vmem:[#allocation4 + $0x68] sm:$0xff]  ;;  %v147_v27 = vld [vmem:[#allocation4 + $0x70] sm:$0xff]  ;;  %v148_v28 = vld [vmem:[#allocation4 + $0x78] sm:$0xff] }
  0x2c   :  { %261 = vmatmul.mubr.msk.f32.vlgmr.msra.gmra.mrb[0].mxu0 %vm58_vm1, %v48_v10  ;;  %v320_v26 = vpack.c.bf16 %v146_v25, %v145_v24  ;;  %v323_v29 = vpack.c.bf16 %v148_v28, %v147_v27  ;;  %v233_v30 = vld [vmem:[%s455_s2] ss:$0 sm:$0xff] }
  0x2d   :  { %306 = vmatpush3.bf16.msra.mxu1 %v305_v11  ;;  %v235_v35 = vld [vmem:[%s457_s4] ss:$0 sm:$0xff] }
  0x2e   :  { %307 = vmatprep.subr.bf16.mxu1 %v384_v0 }
  0x31   :  { %309 = vmatpush3.bf16.msra.mxu1 %v308_v14 }
  0x32   :  { %310 = vmatprep.subr.bf16.mxu1 %v384_v0 }
  0x35   :  { %312 = vmatpush3.bf16.msra.mxu1 %v311_v17 }
  0x36   :  { %313 = vmatprep.subr.bf16.mxu1 %v384_v0 }
  0x39   :  { %315 = vmatpush3.bf16.msra.mxu1 %v314_v20 }
  0x3a   :  { %316 = vmatprep.subr.bf16.mxu1 %v384_v0 }
  0x3d   :  { %318 = vmatpush3.bf16.msra.mxu1 %v317_v23 }
  0x3e   :  { %319 = vmatprep.subr.bf16.mxu1 %v384_v0 }
  0x41   :  { %321 = vmatpush3.bf16.msra.mxu1 %v320_v26 }
  0x42   :  { %322 = vmatprep.subr.bf16.mxu1 %v384_v0 }
  0x45   :  { %324 = vmatpush3.bf16.msra.mxu1 %v323_v29 }
  0xff   :  { %v128_v31 = vpop.f32.mrb[0].mxu0 }
 0x100   :  { %v129_v32 = vadd.f32 %v233_v30, %v128_v31  ;;  %v262_v33 = vpop.f32.mrb[1].mxu0 }
 0x102   :  { %v132_v34 = vmax.f32 %v129_v32, 0.0 }
 0x104   :  { %296 = vmatmul.mubr.f32.vlgmr.msra.gmra.mrb[0].mxu1 %v132_v34 }
 0x1d7   :  { %v222_v36 = vpop.f32.mrb[0].mxu1 }
 0x1d8   :  { %v223_v37 = vadd.f32 %v235_v35, %v222_v36  ;;  %v297_v38 = vpop.f32.mrb[1].mxu1 }
 0x1da   :  { %226 = vst [vmem:[%s458_s5] sm:$0xff] %v223_v37 }
 0x1db   :  { %231 = vsyncpa [#allocation3], 1 }
 0x1dc   :  { %232 = vsyncpa [#allocation5], 1 }

</bundles_post_ra>
